<compile_context>
chip_gen: v6e
topology: v6e:2x2x1
jax: 0.10.0
libtpu: 0.0.40
codegen_flags: <defaults>
</compile_context>

<pallas_src>
import functools

import jax
import jax.numpy as jnp
from jax.experimental import pallas as pl
from jax.experimental.pallas import tpu as pltpu


def _sobel_kernel(x_ref, o_ref, *, img_h, img_w):
    """x_ref/o_ref: (k, L) f32 block; each sublane row is one flattened image."""
    x = x_ref[...]
    k, L = x.shape
    H, W = img_h, img_w

    # ---- rank-1 lane masks, built once per grid step on (1, L) only -------
    t = jax.lax.broadcasted_iota(jnp.int32, (1, L), 1)
    cw = t % W                                   # column index inside a row
    left_col = cw == 0
    right_col = cw == W - 1
    interior_col = jnp.logical_and(jnp.logical_not(left_col),
                                   jnp.logical_not(right_col))
    # +1 on the left image edge, -1 on the right image edge, 0 elsewhere.
    col_sign = left_col.astype(x.dtype) - right_col.astype(x.dtype)

    top_row = t < W
    bot_row = t >= (H - 1) * W
    interior_row = jnp.logical_and(jnp.logical_not(top_row),
                                   jnp.logical_not(bot_row))
    row_sign = top_row.astype(x.dtype) - bot_row.astype(x.dtype)

    # ---- horizontal pass: smooth d = [1,2,1], derivative c = [-1,0,1] -----
    # Rolls wrap inside each sublane row (same image); the wrapped "garbage"
    # taps cancel exactly in the fused reflection formulas below.
    xm1 = pltpu.roll(x, 1, axis=1)          # x[f-1]
    xp1 = pltpu.roll(x, L - 1, axis=1)      # x[f+1]
    c_raw = xp1 - xm1
    # Reflection => horizontal gradient is exactly 0 on the left/right edges.
    c = jnp.where(interior_col, c_raw, 0.0)
    # Reflection-corrected horizontal smooth:
    #   left edge : 2*x + 2*x[+1] = d_raw + c_raw
    #   right edge: 2*x + 2*x[-1] = d_raw - c_raw
    d = (xm1 + xp1) + 2.0 * x + col_sign * c_raw

    # ---- vertical pass (shift by +/- W lanes = +/- 1 image row) -----------
    cmW = pltpu.roll(c, W, axis=1)          # c[i-1]
    cpW = pltpu.roll(c, L - W, axis=1)      # c[i+1]
    dmW = pltpu.roll(d, W, axis=1)          # d[i-1]
    dpW = pltpu.roll(d, L - W, axis=1)      # d[i+1]

    # ugrad: vertical smooth of c with reflection fix-up at top/bottom rows.
    ugrad = (cmW + cpW) + 2.0 * c + row_sign * (cpW - cmW)
    # vgrad: vertical derivative of d; exactly 0 on top/bottom rows.
    vgrad = jnp.where(interior_row, dpW - dmW, 0.0)

    o_ref[...] = jnp.sqrt(ugrad * ugrad + vgrad * vgrad).astype(o_ref.dtype)


def _vmem_capacity_bytes():
    """Best-effort VMEM capacity query; conservative (v7x) fallback."""
    try:
        return int(pltpu.get_tpu_info().vmem_capacity_bytes)
    except Exception:
        return 64 << 20


def _pick_images_per_block(n, img_bytes, target_bytes):
    """Images per block k: sublane-legal (k % 8 == 0 or k == n), prefer >= 2
    grid steps (two v7x TensorCores), largest k that fits the block target."""
    legal = [k for k in range(1, n + 1) if k % 8 == 0 or k == n]
    multi = [k for k in legal if pl.cdiv(n, k) >= 2]
    pool = multi or legal
    fitting = [k for k in pool if k * img_bytes <= target_bytes]
    if fitting:
        return max(fitting)
    # Nothing fits the per-generation target: take the smallest legal block.
    # TODO(synk): a single image whose flattened row alone blows the VMEM
    # budget needs in-image row tiling with a 1-row halo; not implemented.
    return min(pool)


def sobel_filter(gray):
    """gray: (N, 1, H, W) float32 -> (N, 1, H, W) Sobel gradient magnitude."""
    N, C, H, W = gray.shape
    assert C == 1, "SobelFilter expects single-channel (grayscale) input"
    assert H >= 2 and W >= 2, "ReflectionPad2d(1) needs H, W >= 2"

    L = H * W
    x = gray.reshape(N, L)              # free reshape (row-major contiguous)
    itemsize = gray.dtype.itemsize
    img_bytes = L * itemsize

    # Per-generation block target + scoped-VMEM cap with headroom.
    vmem_cap = _vmem_capacity_bytes()
    if vmem_cap <= (64 << 20):          # v7x-class: 64 MiB VMEM, 2 TCs
        cap_limit = 48 << 20
        gen_target = (3 << 20) // 2     # ~1.5 MiB blocks
    else:                               # v5e / v6e: 128 MiB VMEM, HBM-bound
        cap_limit = 96 << 20
        gen_target = 8 << 20

    # Live-buffer accounting: 2x double-buffered in + out (=4 blocks) plus
    # ~10 simultaneously-live full-block temporaries inside the kernel.
    LIVE_BLOCKS = 14
    target_bytes = min(gen_target, cap_limit // LIVE_BLOCKS)

    k = _pick_images_per_block(N, img_bytes, target_bytes)
    grid = (pl.cdiv(N, k),)
    block_bytes = k * img_bytes
    vmem_limit = int(min(cap_limit,
                         max(16 << 20, LIVE_BLOCKS * block_bytes + (2 << 20))))

    # NOTE: on v5e, if profiling shows exposed DMA at block boundaries, add
    # pipeline_mode=pl.Buffered(3) to the input BlockSpec (128 MiB VMEM easily
    # covers it); keep the default double-buffering on v7x (64 MiB budget).
    out = pl.pallas_call(
        functools.partial(_sobel_kernel, img_h=H, img_w=W),
        out_shape=jax.ShapeDtypeStruct((N, L), gray.dtype),
        grid=grid,
        in_specs=[pl.BlockSpec((k, L), lambda i: (i, 0))],
        out_specs=pl.BlockSpec((k, L), lambda i: (i, 0)),
        compiler_params=pltpu.CompilerParams(
            dimension_semantics=("parallel",),
            vmem_limit_bytes=vmem_limit,
        ),
    )(x)
    return out.reshape(N, 1, H, W)


def _sobel_reference(gray):
    # Pure-JAX reference (mirrors the PyTorch module exactly).
    N, C, H, W = gray.shape
    x = gray.reshape(N, H, W)
    p = jnp.pad(x, ((0, 0), (1, 1), (1, 1)), mode="reflect")

    def s(di, dj):
        return p[:, di:di + H, dj:dj + W]

    u = -s(0, 0) + s(0, 2) - 2 * s(1, 0) + 2 * s(1, 2) - s(2, 0) + s(2, 2)
    v = -s(0, 0) - 2 * s(0, 1) - s(0, 2) + s(2, 0) + 2 * s(2, 1) + s(2, 2)
    return jnp.sqrt(u * u + v * v).reshape(N, 1, H, W)


if __name__ == "__main__":
    key = jax.random.PRNGKey(0)
    x = jax.random.normal(key, (2, 1, 16, 16), dtype=jnp.float32)

    out = jax.block_until_ready(sobel_filter(x))
    ref = _sobel_reference(x)

    assert out.shape == (2, 1, 16, 16)
    assert jnp.allclose(out, ref, atol=1e-5, rtol=1e-5), float(
        jnp.max(jnp.abs(out - ref)))

    print("KERNEL_OK")
</pallas_src>

<mosaic_0001>
module attributes {stable_mosaic.version = 11 : i64} {
  func.func @_sobel_kernel(%arg0: i32, %arg1: memref<2x256xf32, #tpu.memory_space<vmem>>, %arg2: memref<2x256xf32, #tpu.memory_space<vmem>>) attributes {dimension_semantics = [#tpu.dimension_semantics<parallel>], iteration_bounds = array<i64: 1>, scalar_prefetch = 0 : i64, scratch_operands = 0 : i64, tpu.core_type = #tpu.core_type<tc>, window_params = [{transform_indices = @transform_0, window_bounds = array<i64: 2, 256>}, {transform_indices = @transform_1, window_bounds = array<i64: 2, 256>}]} {
    %c0 = arith.constant 0 : index
    %c0_0 = arith.constant 0 : index
    %0 = vector.load %arg1[%c0, %c0_0] : memref<2x256xf32, #tpu.memory_space<vmem>>, vector<2x256xf32>
    %1 = tpu.iota {dimensions = array<i32: 1>} : vector<1x256xi32>
    %c16_i32 = arith.constant 16 : i32
    %c0_i32 = arith.constant 0 : i32
    %2 = arith.cmpi eq, %c16_i32, %c0_i32 : i32
    %c1_i32 = arith.constant 1 : i32
    %3 = arith.select %2, %c1_i32, %c16_i32 : i32
    %4 = vector.broadcast %3 : i32 to vector<1x256xi32>
    %5 = arith.remsi %1, %4 : vector<1x256xi32>
    %c0_i32_1 = arith.constant 0 : i32
    %6 = vector.broadcast %c0_i32_1 : i32 to vector<1x256xi32>
    %7 = arith.cmpi ne, %5, %6 : vector<1x256xi32>
    %c0_i32_2 = arith.constant 0 : i32
    %8 = vector.broadcast %c0_i32_2 : i32 to vector<1x256xi32>
    %9 = arith.cmpi slt, %5, %8 : vector<1x256xi32>
    %c0_i32_3 = arith.constant 0 : i32
    %10 = arith.cmpi slt, %3, %c0_i32_3 : i32
    %11 = vector.broadcast %10 : i1 to vector<1x256xi1>
    %12 = vector.broadcast %11 : vector<1x256xi1> to vector<1x256xi1>
    %13 = arith.xori %9, %12 : vector<1x256xi1>
    %14 = arith.andi %13, %7 : vector<1x256xi1>
    %15 = vector.broadcast %3 : i32 to vector<1x256xi32>
    %16 = arith.addi %5, %15 : vector<1x256xi32>
    %17 = arith.select %14, %16, %5 : vector<1x256xi1>, vector<1x256xi32>
    %c0_i32_4 = arith.constant 0 : i32
    %18 = vector.broadcast %c0_i32_4 : i32 to vector<1x256xi32>
    %19 = arith.cmpi eq, %17, %18 : vector<1x256xi32>
    %c15_i32 = arith.constant 15 : i32
    %20 = vector.broadcast %c15_i32 : i32 to vector<1x256xi32>
    %21 = arith.cmpi eq, %17, %20 : vector<1x256xi32>
    %cst = arith.constant dense<true> : vector<1x256xi1>
    %22 = arith.xori %19, %cst : vector<1x256xi1>
    %cst_5 = arith.constant dense<true> : vector<1x256xi1>
    %23 = arith.xori %21, %cst_5 : vector<1x256xi1>
    %24 = arith.andi %22, %23 : vector<1x256xi1>
    %25 = arith.extui %19 : vector<1x256xi1> to vector<1x256xi32>
    %26 = arith.sitofp %25 : vector<1x256xi32> to vector<1x256xf32>
    %27 = arith.extui %21 : vector<1x256xi1> to vector<1x256xi32>
    %28 = arith.sitofp %27 : vector<1x256xi32> to vector<1x256xf32>
    %29 = arith.subf %26, %28 : vector<1x256xf32>
    %c16_i32_6 = arith.constant 16 : i32
    %30 = vector.broadcast %c16_i32_6 : i32 to vector<1x256xi32>
    %31 = arith.cmpi slt, %1, %30 : vector<1x256xi32>
    %c240_i32 = arith.constant 240 : i32
    %32 = vector.broadcast %c240_i32 : i32 to vector<1x256xi32>
    %33 = arith.cmpi sge, %1, %32 : vector<1x256xi32>
    %cst_7 = arith.constant dense<true> : vector<1x256xi1>
    %34 = arith.xori %31, %cst_7 : vector<1x256xi1>
    %cst_8 = arith.constant dense<true> : vector<1x256xi1>
    %35 = arith.xori %33, %cst_8 : vector<1x256xi1>
    %36 = arith.andi %34, %35 : vector<1x256xi1>
    %37 = arith.extui %31 : vector<1x256xi1> to vector<1x256xi32>
    %38 = arith.sitofp %37 : vector<1x256xi32> to vector<1x256xf32>
    %39 = arith.extui %33 : vector<1x256xi1> to vector<1x256xi32>
    %40 = arith.sitofp %39 : vector<1x256xi32> to vector<1x256xf32>
    %41 = arith.subf %38, %40 : vector<1x256xf32>
    %c1_i32_9 = arith.constant 1 : i32
    %42 = tpu.dynamic_rotate %0 by %c1_i32_9 dim 1 : vector<2x256xf32>, i32 -> vector<2x256xf32>
    %c255_i32 = arith.constant 255 : i32
    %43 = tpu.dynamic_rotate %0 by %c255_i32 dim 1 : vector<2x256xf32>, i32 -> vector<2x256xf32>
    %44 = arith.subf %43, %42 : vector<2x256xf32>
    %cst_10 = arith.constant 0.000000e+00 : f32
    %45 = vector.shape_cast %24 : vector<1x256xi1> to vector<1x256xi1>
    %46 = vector.broadcast %45 : vector<1x256xi1> to vector<2x256xi1>
    %47 = vector.broadcast %cst_10 : f32 to vector<2x256xf32>
    %48 = arith.select %46, %44, %47 : vector<2x256xi1>, vector<2x256xf32>
    %49 = arith.addf %42, %43 : vector<2x256xf32>
    %cst_11 = arith.constant 2.000000e+00 : f32
    %50 = vector.broadcast %cst_11 : f32 to vector<2x256xf32>
    %51 = arith.mulf %50, %0 : vector<2x256xf32>
    %52 = arith.addf %49, %51 : vector<2x256xf32>
    %53 = vector.broadcast %29 : vector<1x256xf32> to vector<2x256xf32>
    %54 = arith.mulf %53, %44 : vector<2x256xf32>
    %55 = arith.addf %52, %54 : vector<2x256xf32>
    %c16_i32_12 = arith.constant 16 : i32
    %56 = tpu.dynamic_rotate %48 by %c16_i32_12 dim 1 : vector<2x256xf32>, i32 -> vector<2x256xf32>
    %c240_i32_13 = arith.constant 240 : i32
    %57 = tpu.dynamic_rotate %48 by %c240_i32_13 dim 1 : vector<2x256xf32>, i32 -> vector<2x256xf32>
    %c16_i32_14 = arith.constant 16 : i32
    %58 = tpu.dynamic_rotate %55 by %c16_i32_14 dim 1 : vector<2x256xf32>, i32 -> vector<2x256xf32>
    %c240_i32_15 = arith.constant 240 : i32
    %59 = tpu.dynamic_rotate %55 by %c240_i32_15 dim 1 : vector<2x256xf32>, i32 -> vector<2x256xf32>
    %60 = arith.addf %56, %57 : vector<2x256xf32>
    %cst_16 = arith.constant 2.000000e+00 : f32
    %61 = vector.broadcast %cst_16 : f32 to vector<2x256xf32>
    %62 = arith.mulf %61, %48 : vector<2x256xf32>
    %63 = arith.addf %60, %62 : vector<2x256xf32>
    %64 = arith.subf %57, %56 : vector<2x256xf32>
    %65 = vector.broadcast %41 : vector<1x256xf32> to vector<2x256xf32>
    %66 = arith.mulf %65, %64 : vector<2x256xf32>
    %67 = arith.addf %63, %66 : vector<2x256xf32>
    %68 = arith.subf %59, %58 : vector<2x256xf32>
    %cst_17 = arith.constant 0.000000e+00 : f32
    %69 = vector.shape_cast %36 : vector<1x256xi1> to vector<1x256xi1>
    %70 = vector.broadcast %69 : vector<1x256xi1> to vector<2x256xi1>
    %71 = vector.broadcast %cst_17 : f32 to vector<2x256xf32>
    %72 = arith.select %70, %68, %71 : vector<2x256xi1>, vector<2x256xf32>
    %73 = arith.mulf %67, %67 : vector<2x256xf32>
    %74 = arith.mulf %72, %72 : vector<2x256xf32>
    %75 = arith.addf %73, %74 : vector<2x256xf32>
    %76 = math.sqrt %75 : vector<2x256xf32>
    %c0_18 = arith.constant 0 : index
    %c0_19 = arith.constant 0 : index
    %77 = vector.load %arg2[%c0_18, %c0_19] : memref<2x256xf32, #tpu.memory_space<vmem>>, vector<2x256xf32>
    tpu.vector_store %arg2[%c0_18, %c0_19], %76 {strides = array<i32>} : memref<2x256xf32, #tpu.memory_space<vmem>>, vector<2x256xf32>,
    return
  }
  func.func @transform_0(%arg0: i32) -> (i32, i32) {
    %c0_i32 = arith.constant 0 : i32
    %c0_i32_0 = arith.constant 0 : i32
    return %arg0, %c0_i32 : i32, i32
  }
  func.func @transform_1(%arg0: i32) -> (i32, i32) {
    %c0_i32 = arith.constant 0 : i32
    %c0_i32_0 = arith.constant 0 : i32
    return %arg0, %c0_i32 : i32, i32
  }
}

</mosaic_0001>

<bundles_post_ra>
// kernel: tpu_custom_call.1
= control target key start
LH: loop header
LB: loop body
LE: loop exit
PB: predicated region body
PF: predicated region fallthrough
CT: control target
= control target key end

     0   :  { %6 = vsyncpa [#allocation3], 0  ;;  %s397_s0 = inlined_call_operand.hbm [shape: f32[2,256], index: 0, kind: input, shape index: {}]   ;;  %s398_s1 = inlined_call_operand.hbm [shape: f32[2,256], index: 1, kind: output, shape index: {}]  }
   0x1   :  { %7 = vsyncpa [#allocation4], 0  ;;  %s298_s6 = smov [#allocation2]  }
   0x2   :  { %s14_s7 = sshll.u32 %s298_s6, 4  ;;  %s15_s7 = int_to_ptr.vmem [resolvable:$true] %s14_s7 }
   0x3   :  { %s262_s8 = scalar_lea.vmem %s15_s7, 64  ;;  %p267_p1 = scmp.lt.s32.totalorder %s15_s7, %s15_s7 }
   0x4   :  { %p263_p0 = scmp.ne.s32.totalorder %s15_s7, %s262_s8  ;;  %p268_p2 = scmp.lt.s32.totalorder %s262_s8, %s262_s8 }
   0x6   :  { %p269_p3 = por %p268_p2, %p267_p1 }
   0x8   :  { %p270_p4 = pnand %p269_p3, %p263_p0 }
   0xa   :  { %273 = shalt.err (!%p270_p4)
}
   0xb   :  { %17 = dma.hbm_to_vmem [thread:$0]  %s397_s0, 64, %s15_s7, [#allocation3]  }
   0xc   :  { %294 = dma.done.wait [#allocation3], 64  }
   0xd   :  { %295 = vsyncadd [#allocation3], 4294967232  ;;  %v22_v0 = vlaneseq  ;;  %v299_v1 = vmov 1983009808   ;;  %v21_v6 = vld [vmem:[#allocation2] sm:$0xf] }
   0xe   :  { %v91_v2 = vunpack.c.l.s4 %v299_v1  ;;  %v124_v8 = vmul.f32 2.0, %v21_v6  ;;  %s300_s11 = smov 127   ;;  %s301_s12 = smov 1   ;;  %vm302_vm4 = vmmov 1   ;;  %v303_v23 = vmov 0.0  }
   0xf   :  { %v94_v3 = vshrl.u32 %v22_v0, 7  ;;  %v320_v11 = vand.u32 127, %v22_v0  ;;  %s304_s0 = smov 16   ;;  %s305_s13 = smov 112  }
  0x10   :  { %v92_v4 = vunpack.c.0.s8 %v91_v2  ;;  %s306_s14 = smov [#allocation5]  }
  0x11   :  { %v323_v12 = vadd.s32 128, %v320_v11  ;;  %v29_v13 = vand.u32 15, %v320_v11  ;;  %vm111_vm7 = vcmp.lt.s32.totalorder %v320_v11, 127  ;;  %vm104_vm8 = vcmp.lt.s32.totalorder %v320_v11, 1  ;;  %s225_s15 = sshll.u32 %s306_s14, 4  ;;  %s226_s15 = int_to_ptr.vmem [resolvable:$true] %s225_s15 }
  0x12   :  { %v95_v5 = vsub.s32 %v92_v4, %v94_v3  ;;  %vm69_vm14 = vcmp.lt.s32.totalorder %v320_v11, 16  ;;  %vm152_vm15 = vcmp.lt.s32.totalorder %v320_v11, 112  ;;  %s274_s16 = scalar_lea.vmem %s226_s15, 64  ;;  %p279_p6 = scmp.lt.s32.totalorder %s226_s15, %s226_s15 }
  0x13   :  { %v36_v14 = vand.u32 15, %v323_v12  ;;  %vm49_vm0 = vcmp.eq.s32.totalorder %v29_v13, 0  ;;  %vm327_vm1 = vcmp.eq.s32.totalorder %v29_v13, 15  ;;  %vm72_vm13 = vcmp.ge.s32.totalorder %v323_v12, 240  ;;  %p275_p5 = scmp.ne.s32.totalorder %s226_s15, %s274_s16  ;;  %p280_p7 = scmp.lt.s32.totalorder %s274_s16, %s274_s16 }
  0x14   :  { %v96_v7 = vrot.slane %v21_v6, %v95_v5  ;;  %v132_v10 = vrot.slane %v124_v8, %v95_v5  ;;  %vm332_vm5 = vmxor %vm49_vm0, %vm302_vm4  ;;  %v234_v24 = vsel %vm49_vm0, 1.0, %v303_v23  ;;  %v236_v26 = vsel %vm327_vm1, 1.0, %v303_v23 }
  0x15   :  { %vm50_vm2 = vcmp.eq.s32.totalorder %v36_v14, 0  ;;  %vm52_vm3 = vcmp.eq.s32.totalorder %v36_v14, 15  ;;  %vm339_vm6 = vmxor %vm327_vm1, %vm302_vm4  ;;  %v67_v35 = vsub.f32 %v234_v24, %v236_v26  ;;  %v239_v50 = vsel %vm72_vm13, 1.0, %v303_v23  ;;  %p281_p8 = por %p280_p7, %p279_p6 }
  0x16   :  { %107 = vrot.lane.b32.xlu1 %v96_v7, %s300_s11  ;;  %100 = vrot.lane.b32.xlu0 %v96_v7, %s301_s12  ;;  %v97_v9 = vcombine.high %v96_v7, %v96_v7  ;;  %vm346_vm9 = vmxor %vm50_vm2, %vm302_vm4  ;;  %v235_v25 = vsel %vm50_vm2, 1.0, %v303_v23  ;;  %v237_v27 = vsel %vm52_vm3, 1.0, %v303_v23  ;;  %v133_v37 = vcombine.high %v132_v10, %v132_v10 }
  0x17   :  { %vm351_vm10 = vmxor %vm52_vm3, %vm302_vm4  ;;  %v68_v36 = vsub.f32 %v235_v25, %v237_v27  ;;  %v238_v52 = vsel %vm69_vm14, 1.0, %v303_v23  ;;  %v88_v53 = vsub.f32 0.0, %v239_v50  ;;  %p282_p9 = pnand %p281_p8, %p275_p5 }
  0x18   :  { %vm57_vm11 = vmand %vm332_vm5, %vm339_vm6 }
  0x19   :  { %vm58_vm12 = vmand %vm346_vm9, %vm351_vm10 }
  0x1a   :  { %109 = vrot.lane.b32.xlu1 %v97_v9, %s300_s11  ;;  %102 = vrot.lane.b32.xlu0 %v97_v9, %s301_s12  ;;  %vm73_vm0 = vmxor %vm69_vm14, %vm302_vm4 }
  0x1b   :  { %vm76_vm1 = vmxor %vm72_vm13, %vm302_vm4 }
  0x88   :  { %v108_v16 = vpop.permute.xlu1 %107  ;;  %v101_v17 = vpop.permute.xlu0 %100 }
  0x8c   :  { %v110_v22 = vpop.permute.xlu1 %109  ;;  %v103_v28 = vpop.permute.xlu0 %102 }
  0x8d   :  { %v112_v29 = vsel %vm111_vm7, %v108_v16, %v110_v22  ;;  %v113_v30 = vsel %vm111_vm7, %v110_v22, %v108_v16  ;;  %v105_v31 = vsel %vm104_vm8, %v101_v17, %v103_v28  ;;  %v106_v32 = vsel %vm104_vm8, %v103_v28, %v101_v17 }
  0x8e   :  { %v114_v33 = vsub.f32 %v112_v29, %v106_v32  ;;  %v115_v34 = vsub.f32 %v113_v30, %v105_v31  ;;  %v122_v38 = vadd.f32 %v112_v29, %v106_v32  ;;  %v123_v39 = vadd.f32 %v113_v30, %v105_v31 }
  0x90   :  { %v120_v40 = vsel %vm57_vm11, %v114_v33, 0.0  ;;  %v121_v41 = vsel %vm58_vm12, %v115_v34, 0.0  ;;  %v136_v42 = vadd.f32 %v132_v10, %v122_v38  ;;  %v137_v43 = vadd.f32 %v133_v37, %v123_v39 }
  0x91   :  { %142 = vrot.lane.b32.xlu0 %v120_v40, %s304_s0  ;;  %144 = vrot.lane.b32.xlu1 %v121_v41, %s304_s0  ;;  %v138_v44 = vmul.f32 %v114_v33, %v67_v35  ;;  %v139_v45 = vmul.f32 %v115_v34, %v68_v36  ;;  %v169_v63 = vmul.f32 2.0, %v120_v40  ;;  %v170_v0 = vmul.f32 2.0, %v121_v41 }
  0x93   :  { %v140_v46 = vadd.f32 %v138_v44, %v136_v42  ;;  %v141_v47 = vadd.f32 %v139_v45, %v137_v43 }
  0x95   :  { %148 = vrot.lane.b32.xlu0 %v120_v40, %s305_s13  ;;  %150 = vrot.lane.b32.xlu1 %v121_v41, %s305_s13 }
  0x99   :  { %155 = vrot.lane.b32.xlu0 %v140_v46, %s304_s0  ;;  %157 = vrot.lane.b32.xlu1 %v141_v47, %s304_s0 }
  0x9d   :  { %161 = vrot.lane.b32.xlu0 %v140_v46, %s305_s13  ;;  %163 = vrot.lane.b32.xlu1 %v141_v47, %s305_s13 }
 0x103   :  { %v143_v48 = vpop.permute.xlu0 %142  ;;  %v145_v49 = vpop.permute.xlu1 %144 }
 0x104   :  { %v146_v55 = vsel %vm69_vm14, %v143_v48, %v145_v49  ;;  %v147_v56 = vsel %vm69_vm14, %v145_v49, %v143_v48 }
 0x107   :  { %v149_v51 = vpop.permute.xlu0 %148  ;;  %v151_v54 = vpop.permute.xlu1 %150 }
 0x108   :  { %v153_v57 = vsel %vm152_vm15, %v149_v51, %v151_v54  ;;  %v154_v58 = vsel %vm152_vm15, %v151_v54, %v149_v51 }
 0x109   :  { %v167_v59 = vadd.f32 %v153_v57, %v147_v56  ;;  %v168_v60 = vadd.f32 %v154_v58, %v146_v55  ;;  %v173_v61 = vsub.f32 %v153_v57, %v147_v56  ;;  %v174_v62 = vsub.f32 %v154_v58, %v146_v55 }
 0x10b   :  { %v156_v1 = vpop.permute.xlu0 %155  ;;  %v158_v2 = vpop.permute.xlu1 %157  ;;  %v171_v3 = vadd.f32 %v169_v63, %v167_v59  ;;  %v172_v4 = vadd.f32 %v170_v0, %v168_v60  ;;  %v175_v5 = vmul.f32 %v238_v52, %v173_v61  ;;  %v176_v6 = vmul.f32 %v174_v62, %v88_v53 }
 0x10c   :  { %v159_v7 = vsel %vm69_vm14, %v156_v1, %v158_v2  ;;  %v160_v8 = vsel %vm69_vm14, %v158_v2, %v156_v1 }
 0x10d   :  { %v177_v13 = vadd.f32 %v175_v5, %v171_v3  ;;  %v178_v14 = vadd.f32 %v176_v6, %v172_v4 }
 0x10f   :  { %v162_v9 = vpop.permute.xlu0 %161  ;;  %v164_v10 = vpop.permute.xlu1 %163  ;;  %v187_v21 = vmul.f32 %v177_v13, %v177_v13  ;;  %v188_v22 = vmul.f32 %v178_v14, %v178_v14 }
 0x110   :  { %v165_v15 = vsel %vm152_vm15, %v162_v9, %v164_v10  ;;  %v166_v16 = vsel %vm152_vm15, %v164_v10, %v162_v9 }
 0x111   :  { %v179_v17 = vsub.f32 %v165_v15, %v160_v8  ;;  %v180_v18 = vsub.f32 %v166_v16, %v159_v7 }
 0x113   :  { %v185_v19 = vsel %vm73_vm0, %v179_v17, 0.0  ;;  %v186_v20 = vsel %vm76_vm1, %v180_v18, 0.0 }
 0x114   :  { %v189_v23 = vmul.f32 %v185_v19, %v185_v19  ;;  %v190_v24 = vmul.f32 %v186_v20, %v186_v20 }
 0x116   :  { %v191_v25 = vadd.f32 %v189_v23, %v187_v21  ;;  %v192_v26 = vadd.f32 %v190_v24, %v188_v22 }
 0x118   :  { %250 = vrsqrt.f32 %v191_v25  ;;  %vm195_vm2 = vcmp.eq.f32.partialorder %v191_v25, inf  ;;  %v198_v29 = vand.u32 2147483648, %v191_v25  ;;  %vm197_vm3 = vcmp.eq.f32.partialorder %v191_v25, 0.0 }
 0x119   :  { %252 = vrsqrt.f32 %v192_v26  ;;  %vm202_vm4 = vcmp.eq.f32.partialorder %v192_v26, inf  ;;  %v205_v31 = vand.u32 2147483648, %v192_v26  ;;  %vm204_vm5 = vcmp.eq.f32.partialorder %v192_v26, 0.0 }
 0x125   :  { %v251_v12 = vpop.eup %250 }
 0x126   :  { %v253_v27 = vpop.eup %252  ;;  %v194_v28 = vmul.f32 %v251_v12, %v191_v25 }
 0x127   :  { %v201_v30 = vmul.f32 %v253_v27, %v192_v26 }
 0x128   :  { %v196_v11 = vsel %vm195_vm2, %v191_v25, %v194_v28 }
 0x129   :  { %v199_v32 = vsel %vm197_vm3, %v198_v29, %v196_v11  ;;  %v203_v33 = vsel %vm202_vm4, %v192_v26, %v201_v30 }
 0x12a   :  { %v206_v34 = vsel %vm204_vm5, %v205_v31, %v203_v33 }
 0x12b   :  { %v209_v35 = vcombine.low %v199_v32, %v206_v34 }
 0x12d   :  { %240 = vst.sshfl [vmem:[#allocation5] sm:$0x33 pattern:$0x76325410] %v209_v35 }
 0x12e   :  { %285 = shalt.err (!%p282_p9)
}
 0x12f   :  { %228 = dma.vmem_to_hbm [thread:$0]  %s226_s15, 64, %s398_s1, [#allocation4]  }
 0x130   :  { %296 = dma.done.wait [#allocation4], 64  }
 0x131   :  { %297 = vsyncadd [#allocation4], 4294967232 }
 0x132   :  { %232 = vsyncpa [#allocation3], 1 }
 0x133   :  { %233 = vsyncpa [#allocation4], 1 }

</bundles_post_ra>
